<compile_context>
chip_gen: v6e
topology: v6e:2x2x1
jax: 0.10.0
libtpu: 0.0.40
codegen_flags: <defaults>
</compile_context>

<pallas_src>
import jax
import jax.numpy as jnp
from jax.experimental import pallas as pl
from jax.experimental.pallas import tpu as pltpu


def conv_wave_kernel(x_ref, w1_ref, b1_ref, w2_ref, b2_ref, o_ref):
    # x_ref:  (Cin, THW)  channels on sublanes, pixels on lanes (lane-dense)
    # w1_ref: (F, Cin)    conv1 weight (resident, constant index_map)
    # b1_ref: (F, 1)
    # w2_ref: (F, F)      conv2 weight (resident)
    # b2_ref: (F, 1)
    # o_ref:  (F, THW)    lane-dense output block
    h = jnp.dot(w1_ref[...], x_ref[...],
                preferred_element_type=jnp.float32,
                precision=jax.lax.Precision.HIGHEST) + b1_ref[...]
    h = jnp.maximum(h, 0.2 * h)          # LeakyReLU(0.2), single VPU max
    y = jnp.dot(w2_ref[...], h,
                preferred_element_type=jnp.float32,
                precision=jax.lax.Precision.HIGHEST) + b2_ref[...]
    o_ref[...] = y.astype(o_ref.dtype)


def _physical_vmem_bytes():
    """Per-TensorCore VMEM capacity; conservative v7x value if query fails."""
    try:
        info = pltpu.get_tpu_info()
        cap = getattr(info, "vmem_capacity_bytes", None)
        if cap:
            return int(cap)
    except Exception:
        pass
    return 64 * 1024 * 1024  # v7x per-TC VMEM (smallest of v5e/v6e/v7x)


def conv_wave_forward(x_nchw, w1, b1, w2, b2, *, max_tile_hw=65536,
                      out_dtype=None):
    """x_nchw: (N, 3, H, W).  w1: (F, 3), b1: (F,), w2: (F, F), b2: (F,)."""
    N, Cin, H, W = x_nchw.shape
    F = w1.shape[0]
    HW = H * W

    out_dtype = jnp.dtype(x_nchw.dtype) if out_dtype is None else jnp.dtype(out_dtype)
    in_itemsize = jnp.dtype(x_nchw.dtype).itemsize
    out_itemsize = out_dtype.itemsize

    # ---- VMEM-aware pixel-tile choice -------------------------------------
    vmem_cap = _physical_vmem_bytes()
    buffer_budget = int(vmem_cap * 0.55)     # headroom for temps / weight bufs
    per_pixel = 2 * Cin * in_itemsize + 2 * F * out_itemsize + 4 * F
    tile_hw = min(max_tile_hw, max(128, buffer_budget // per_pixel))
    if HW <= tile_hw:
        tile_hw = HW                          # single full block (full-dim legal)
    else:
        tile_hw = max(128, (tile_hw // 128) * 128)   # lane-dense multiple of 128
    num_tiles = pl.cdiv(HW, tile_hw)          # ragged tail handled by Pallas

    # v7x megacore: make sure there are >= 2 grid steps so both TCs get work.
    if N * num_tiles < 2 and HW >= 256:
        tile_hw = ((pl.cdiv(HW, 2) + 127) // 128) * 128
        num_tiles = pl.cdiv(HW, tile_hw)

    buffers_bytes = (2 * Cin * tile_hw * in_itemsize
                     + 2 * F * tile_hw * out_itemsize
                     + F * tile_hw * 4
                     + 2 * (F * Cin + F * F + 2 * F) * 4)
    vmem_limit = int(min(vmem_cap * 0.9,
                         max(2 * buffers_bytes, 32 * 1024 * 1024)))

    # NCHW -> (N, Cin, H*W): pure reshape, no HBM transpose / pad traffic.
    x_rows = x_nchw.reshape(N, Cin, HW)
    b1_c = b1.reshape(F, 1)
    b2_c = b2.reshape(F, 1)

    # True streamed bytes (no padding) — advisory for XLA's scheduler.
    flops = 2 * N * HW * (Cin * F + F * F)
    bytes_accessed = (N * HW * (Cin * in_itemsize + F * out_itemsize)
                      + (F * Cin + F * F + 2 * F) * 4)
    cost = pl.CostEstimate(flops=flops, transcendentals=0,
                           bytes_accessed=bytes_accessed)

    out_rows = pl.pallas_call(
        conv_wave_kernel,
        out_shape=jax.ShapeDtypeStruct((N, F, HW), out_dtype),
        grid_spec=pltpu.PrefetchScalarGridSpec(
            num_scalar_prefetch=0,
            grid=(N, num_tiles),
            in_specs=[
                # batch dim squeezed; channels on sublanes, pixels on lanes
                pl.BlockSpec((None, Cin, tile_hw), lambda n, t: (n, 0, t)),
                pl.BlockSpec((F, Cin), lambda n, t: (0, 0)),   # W1 (resident)
                pl.BlockSpec((F, 1), lambda n, t: (0, 0)),     # b1
                pl.BlockSpec((F, F), lambda n, t: (0, 0)),     # W2 (resident)
                pl.BlockSpec((F, 1), lambda n, t: (0, 0)),     # b2
            ],
            out_specs=pl.BlockSpec((None, F, tile_hw), lambda n, t: (n, 0, t)),
        ),
        compiler_params=pltpu.CompilerParams(
            dimension_semantics=("parallel", "parallel"),
            vmem_limit_bytes=vmem_limit,
        ),
        cost_estimate=cost,
    )(x_rows, w1, b1_c, w2, b2_c)

    # (N, F, H*W) -> NCHW, free reshape (no slicing needed: output is exact HW).
    return out_rows.reshape(N, F, H, W)


def init_params(num_features, key):
    """Deterministic init matching the PyTorch layer shapes.
    conv1: weight (F, 3, 1, 1) -> (F, 3), bias (F,)
    conv2: weight (F, F, 1, 1) -> (F, F), bias (F,)
    (PyTorch-style uniform(-1/sqrt(fan_in), 1/sqrt(fan_in)).)"""
    k1, k2, k3, k4 = jax.random.split(key, 4)
    F = num_features
    bound1 = 1.0 / jnp.sqrt(3.0)
    bound2 = 1.0 / jnp.sqrt(float(F))
    w1 = jax.random.uniform(k1, (F, 3), jnp.float32, -bound1, bound1)
    b1 = jax.random.uniform(k2, (F,), jnp.float32, -bound1, bound1)
    w2 = jax.random.uniform(k3, (F, F), jnp.float32, -bound2, bound2)
    b2 = jax.random.uniform(k4, (F,), jnp.float32, -bound2, bound2)
    return w1, b1, w2, b2


def conv_wave_reference(x_nchw, w1, b1, w2, b2):
    """Plain-JAX reference of the PyTorch forward (NCHW semantics)."""
    hp = jax.lax.Precision.HIGHEST
    h = jnp.einsum("nchw,fc->nfhw", x_nchw, w1, precision=hp) \
        + b1[None, :, None, None]
    h = jnp.maximum(h, 0.2 * h)
    y = jnp.einsum("nchw,fc->nfhw", h, w2, precision=hp) \
        + b2[None, :, None, None]
    return y


if __name__ == "__main__":
    key = jax.random.PRNGKey(0)
    kx, kp = jax.random.split(key)

    N, C, H, W = 2, 3, 16, 16          # Conv_Wave expects 3 input channels
    num_features = 32

    x = jax.random.normal(kx, (N, C, H, W), dtype=jnp.float32)
    w1, b1, w2, b2 = init_params(num_features, kp)

    out = conv_wave_forward(x, w1, b1, w2, b2)
    out = jax.block_until_ready(out)

    ref = conv_wave_reference(x, w1, b1, w2, b2)
    assert out.shape == (N, num_features, H, W), out.shape
    assert jnp.allclose(out, ref, atol=1e-5, rtol=1e-5), float(
        jnp.max(jnp.abs(out - ref))
    )

    print("KERNEL_OK")
</pallas_src>

<mosaic_0001>
module attributes {stable_mosaic.version = 11 : i64} {
  func.func @conv_wave_kernel(%arg0: i32, %arg1: i32, %arg2: memref<1x3x256xf32, #tpu.memory_space<vmem>>, %arg3: memref<32x3xf32, #tpu.memory_space<vmem>>, %arg4: memref<32x1xf32, #tpu.memory_space<vmem>>, %arg5: memref<32x32xf32, #tpu.memory_space<vmem>>, %arg6: memref<32x1xf32, #tpu.memory_space<vmem>>, %arg7: memref<1x32x256xf32, #tpu.memory_space<vmem>>) attributes {dimension_semantics = [#tpu.dimension_semantics<parallel>, #tpu.dimension_semantics<parallel>], iteration_bounds = array<i64: 2, 1>, scalar_prefetch = 0 : i64, scratch_operands = 0 : i64, tpu.core_type = #tpu.core_type<tc>, window_params = [{transform_indices = @transform_0, window_bounds = array<i64: 1, 3, 256>}, {pipeline_mode = #tpu.pipeline_mode<synchronous>, transform_indices = @transform_1, window_bounds = array<i64: 32, 3>}, {pipeline_mode = #tpu.pipeline_mode<synchronous>, transform_indices = @transform_2, window_bounds = array<i64: 32, 1>}, {pipeline_mode = #tpu.pipeline_mode<synchronous>, transform_indices = @transform_3, window_bounds = array<i64: 32, 32>}, {pipeline_mode = #tpu.pipeline_mode<synchronous>, transform_indices = @transform_4, window_bounds = array<i64: 32, 1>}, {transform_indices = @transform_5, window_bounds = array<i64: 1, 32, 256>}]} {
    %c0 = arith.constant 0 : index
    %c0_0 = arith.constant 0 : index
    %0 = vector.load %arg3[%c0, %c0_0] : memref<32x3xf32, #tpu.memory_space<vmem>>, vector<32x3xf32>
    %c0_1 = arith.constant 0 : index
    %c0_2 = arith.constant 0 : index
    %c0_3 = arith.constant 0 : index
    %1 = vector.load %arg2[%c0_1, %c0_2, %c0_3] : memref<1x3x256xf32, #tpu.memory_space<vmem>>, vector<1x3x256xf32>
    %2 = vector.shape_cast %1 : vector<1x3x256xf32> to vector<3x256xf32>
    %cst = arith.constant dense<0.000000e+00> : vector<32x256xf32>
    %3 = tpu.matmul %0, %2, %cst {dimension_numbers = #tpu.dot_dimension_numbers<[1], [0], [0], [1], [0, 0, 1, 1], [], []>, precision = #tpu.contract_precision<fp32>} : vector<32x3xf32>, vector<3x256xf32>, vector<32x256xf32> -> vector<32x256xf32>
    %c0_4 = arith.constant 0 : index
    %c0_5 = arith.constant 0 : index
    %4 = vector.load %arg4[%c0_4, %c0_5] : memref<32x1xf32, #tpu.memory_space<vmem>>, vector<32x1xf32>
    %5 = vector.broadcast %4 : vector<32x1xf32> to vector<32x256xf32>
    %6 = arith.addf %3, %5 : vector<32x256xf32>
    %cst_6 = arith.constant 2.000000e-01 : f32
    %7 = vector.broadcast %cst_6 : f32 to vector<32x256xf32>
    %8 = arith.mulf %7, %6 : vector<32x256xf32>
    %9 = arith.maximumf %6, %8 : vector<32x256xf32>
    %c0_7 = arith.constant 0 : index
    %c0_8 = arith.constant 0 : index
    %10 = vector.load %arg5[%c0_7, %c0_8] : memref<32x32xf32, #tpu.memory_space<vmem>>, vector<32x32xf32>
    %cst_9 = arith.constant dense<0.000000e+00> : vector<32x256xf32>
    %11 = tpu.matmul %10, %9, %cst_9 {dimension_numbers = #tpu.dot_dimension_numbers<[1], [0], [0], [1], [0, 0, 1, 1], [], []>, precision = #tpu.contract_precision<fp32>} : vector<32x32xf32>, vector<32x256xf32>, vector<32x256xf32> -> vector<32x256xf32>
    %c0_10 = arith.constant 0 : index
    %c0_11 = arith.constant 0 : index
    %12 = vector.load %arg6[%c0_10, %c0_11] : memref<32x1xf32, #tpu.memory_space<vmem>>, vector<32x1xf32>
    %13 = vector.broadcast %12 : vector<32x1xf32> to vector<32x256xf32>
    %14 = arith.addf %11, %13 : vector<32x256xf32>
    %c0_12 = arith.constant 0 : index
    %c0_13 = arith.constant 0 : index
    %c0_14 = arith.constant 0 : index
    %15 = vector.load %arg7[%c0_12, %c0_13, %c0_14] : memref<1x32x256xf32, #tpu.memory_space<vmem>>, vector<1x32x256xf32>
    %16 = vector.shape_cast %15 : vector<1x32x256xf32> to vector<32x256xf32>
    %17 = vector.shape_cast %14 : vector<32x256xf32> to vector<1x32x256xf32>
    tpu.vector_store %arg7[%c0_12, %c0_13, %c0_14], %17 {strides = array<i32>} : memref<1x32x256xf32, #tpu.memory_space<vmem>>, vector<1x32x256xf32>,
    return
  }
  func.func @transform_0(%arg0: i32, %arg1: i32) -> (i32, i32, i32) {
    %c0_i32 = arith.constant 0 : i32
    %c0_i32_0 = arith.constant 0 : i32
    return %arg0, %c0_i32, %arg1 : i32, i32, i32
  }
  func.func @transform_1(%arg0: i32, %arg1: i32) -> (i32, i32) {
    %c0_i32 = arith.constant 0 : i32
    %c0_i32_0 = arith.constant 0 : i32
    %c0_i32_1 = arith.constant 0 : i32
    return %c0_i32, %c0_i32_0 : i32, i32
  }
  func.func @transform_2(%arg0: i32, %arg1: i32) -> (i32, i32) {
    %c0_i32 = arith.constant 0 : i32
    %c0_i32_0 = arith.constant 0 : i32
    %c0_i32_1 = arith.constant 0 : i32
    return %c0_i32, %c0_i32_0 : i32, i32
  }
  func.func @transform_3(%arg0: i32, %arg1: i32) -> (i32, i32) {
    %c0_i32 = arith.constant 0 : i32
    %c0_i32_0 = arith.constant 0 : i32
    %c0_i32_1 = arith.constant 0 : i32
    return %c0_i32, %c0_i32_0 : i32, i32
  }
  func.func @transform_4(%arg0: i32, %arg1: i32) -> (i32, i32) {
    %c0_i32 = arith.constant 0 : i32
    %c0_i32_0 = arith.constant 0 : i32
    %c0_i32_1 = arith.constant 0 : i32
    return %c0_i32, %c0_i32_0 : i32, i32
  }
  func.func @transform_5(%arg0: i32, %arg1: i32) -> (i32, i32, i32) {
    %c0_i32 = arith.constant 0 : i32
    %c0_i32_0 = arith.constant 0 : i32
    return %arg0, %c0_i32, %arg1 : i32, i32, i32
  }
}

</mosaic_0001>

<bundles_post_ra>
// kernel: tpu_custom_call.1
= control target key start
LH: loop header
LB: loop body
LE: loop exit
PB: predicated region body
PF: predicated region fallthrough
CT: control target
= control target key end

     0   :  { %10 = vsyncpa [#allocation3], 0  ;;  %s2433_s0 = inlined_call_operand.vmem [shape: f32[2,3,256], index: 0, kind: input, shape index: {}]   ;;  %s2434_s1 = inlined_call_operand.vmem [shape: f32[32,3], index: 1, kind: input, shape index: {}]   ;;  %s2435_s2 = inlined_call_operand.vmem [shape: f32[32,1], index: 2, kind: input, shape index: {}]   ;;  %s2436_s3 = inlined_call_operand.vmem [shape: f32[32,32], index: 3, kind: input, shape index: {}]   ;;  %s2437_s4 = inlined_call_operand.vmem [shape: f32[32,1], index: 4, kind: input, shape index: {}]   ;;  %s2438_s5 = inlined_call_operand.hbm [shape: f32[2,32,256], index: 5, kind: output, shape index: {}]  }
   0x1   :  { %12 = vsyncpa [#allocation3 + $0x1], 0  ;;  %s1955_s18 = smov 0   ;;  %s1957_s19 = smov 0  }
   0x2   :  { %s1959_s20 = smov 0   ;;  %s1961_s21 = smov 0  }
   0x3   :  { %s1963_s22 = smov 0   ;;  %s1965_s23 = smov 0  }
   0x4 LB: > { %s1765_s24 = sadd.s32 4294967295, %s1918_s23   ;;  %s1766_s25 = sadd.s32 4294967294, %s1918_s23   ;;  %s1918_s23 = sphi %s1965_s23, %s18_s23   ;;  %s1914_s22 = sphi %s1963_s22, %s2445_s22   ;;  %s1910_s21 = sphi %s1961_s21, %s2444_s21   ;;  %s1906_s20 = sphi %s1959_s20, %s2443_s20   ;;  %s1902_s19 = sphi %s1957_s19, %s2442_s19   ;;  %s1898_s18 = sphi %s1955_s18, %s2441_s18  }
   0x5   : > { %s30_s26 = sadd.s32 1, %s1914_s22  ;;  %s151_s27 = sadd.s32 1, %s1906_s20 }
   0x6   : > { %p32_p0 = scmp.ge.s32.totalorder %s30_s26, 2  ;;  %p161_p1 = scmp.ne.s32.totalorder %s1906_s20, %s1902_s19 }
   0x7   : > { %p162_p2 = scmp.eq.s32.totalorder %s1765_s24, 1  ;;  %p167_p3 = scmp.ne.s32.totalorder %s1902_s19, %s1898_s18 }
   0x8   : > { %s2447_s26 = smov (%p32_p0, %s30_s26), 0  ;;  %p168_p5 = scmp.eq.s32.totalorder %s1766_s25, 1 }
   0x9   : > { %p1995_p4 = por %p162_p2, %p161_p1  ;;  %s146_s29 = ssub.s32 %s1914_s22, %s2447_s26 }
   0xa   : > { %p1769_p6 = scmp.ge.s32.totalorder %s1918_s23, 1  ;;  %p149_p7 = scmp.eq.s32.totalorder %s146_s29, 0 }
   0xb   : > { %p2002_p8 = por %p168_p5, %p167_p3  ;;  %p211_p9 = scmp.lt.s32.totalorder %s1918_s23, 3 }
   0xc   : > { %s2008_s6 = scalar_select %p149_p7, %s1906_s20, %s151_s27  }
   0xd   : > { %p212_p10 = pnand %p1769_p6, %p211_p9 }
   0xe   : > { %p244_p11 = scmp.lt.s32.totalorder (!%p212_p10), %s1910_s21, 1  ;;  %s240_s14 = sand.u32 (!%p212_p10), 1, %s1902_s19  }
   0xf   : > { %215 = sbr.rel (%p212_p10) target bundleno = 562 (0x232), region = 40  ;;  %s1770_s15 = sshll.u32 (!%p212_p10), %s240_s14, 6 }
  0x10   : > { %s2364_s16 = scalar_lea.vmem (!%p212_p10), [#allocation2], %s1770_s15  ;;  %s1922_s8 = smov (!%p212_p10), [#allocation2]  }
  0x11   : > { %s1686_s24 = sshll.u32 (!%p212_p10), %s2364_s16, 4  ;;  %s1846_s9 = sshll.u32 (!%p212_p10), %s1922_s8, 4  ;;  %s2382_s24 = int_to_ptr.vmem [resolvable:$true] %s1686_s24  ;;  %s1847_s9 = int_to_ptr.vmem [resolvable:$false] %s1846_s9 }
  0x12   : > { %s1842_s7 = scalar_lea.vmem (!%p212_p10), %s2382_s24, 1024  ;;  %p1849_p1 = scmp.lt.s32.totalorder (!%p212_p10), %s2382_s24, %s1847_s9 }
  0x13   : > { %p1843_p12 = scmp.ne.s32.totalorder (!%p212_p10), %s2382_s24, %s1842_s7 }
  0x14   : > { %v254_v0 = vld [vmem:[%s2434_s1] sm:$0xff]  ;;  %vm285_vm0 = vcmask 23552   ;;  %v255_v1 = vld [vmem:[%s2434_s1 + $0x8] sm:$0xff]  ;;  %v1920_v2 = vmov 0.0   ;;  %v256_v5 = vld [vmem:[%s2434_s1 + $0x10] sm:$0xff]  ;;  %s245_s17 = scalar_select %p244_p11, %s1910_s21, 1 }
  0x15   : > { %369 = vmatprep.mubr.f32.mxu0 %v1920_v2  ;;  %v287_v3 = vsel %vm285_vm0, %v254_v0, 0  ;;  %v290_v4 = vsel %vm285_vm0, %v255_v1, 0  ;;  %488 = vmatprep.mubr.f32.mxu1 %v1920_v2  ;;  %v257_v6 = vld [vmem:[%s2434_s1 + $0x18] sm:$0xff]  ;;  %v260_v7 = vld [vmem:[%s2435_s2 + $0x8] sm:$0xff]  ;;  %v293_v10 = vsel %vm285_vm0, %v256_v5, 0  ;;  %v1921_v12 = vmov 0   ;;  %p1844_p13 = pnand %p1843_p12, %p1995_p4 }
  0x16   : > { %v2029_v8 = vand.u32 4294901760, %v287_v3  ;;  %v2031_v9 = vand.u32 4294901760, %v290_v4  ;;  %v296_v11 = vsel %vm285_vm0, %v257_v6, 0  ;;  %1840 = vset.pattern.permute.xlu1 %v1921_v12  ;;  %1839 = vset.pattern.permute.xlu0 %v1921_v12  ;;  %v2033_v13 = vand.u32 4294901760, %v293_v10  ;;  %v262_v14 = vld [vmem:[%s2435_s2 + $0x18] sm:$0xff]  ;;  %s1778_s27 = sshll.u32 %s245_s17, 3 }
  0x17   : > { %270 = vperm.xlu1 %1840, %v260_v7   ;;  %vm298_vm1 = vcmask 1042432   ;;  %v259_v17 = vld [vmem:[%s2435_s2] sm:$0xff]  ;;  %280 = vperm.xlu0 %1839, %v262_v14   ;;  %s251_s10 = scalar_lea.vmem %s2433_s0, %s1778_s27  ;;  %v2053_v19 = vand.u32 4294901760, %v296_v11  ;;  %v261_v20 = vld [vmem:[%s2435_s2 + $0x10] sm:$0xff]  ;;  %v936_v28 = vld [vmem:[%s2437_s4 + $0x8] sm:$0xff]  ;;  %vm959_vm2 = vcmask 261120   ;;  %p1845_p0 = pneg %p1844_p13 }
  0x18   : > { %v2039_v15 = vsub.f32 %v287_v3, %v2029_v8  ;;  %v2042_v16 = vsub.f32 %v290_v4, %v2031_v9  ;;  %v2051_v18 = vsub.f32 %v293_v10, %v2033_v13  ;;  %v258_v21 = vld [vmem:[%s251_s10] sm:$0x77]  ;;  %v937_v40 = vld [vmem:[%s2437_s4 + $0x10] sm:$0xff]  ;;  %v938_v45 = vld [vmem:[%s2437_s4 + $0x18] sm:$0xff]  ;;  %s1779_s17 = sshll.u32 %s1910_s21, 10  ;;  %s2388_s21 = scalar_lea.sflag [#allocation3], %s240_s14 }
  0x19   : > { %v284_v24 = vcombine.high %v258_v21, %v258_v21  ;;  %v299_v25 = vsel %vm298_vm1, %v258_v21, 0  ;;  %v2072_v31 = vsub.f32 %v296_v11, %v2053_v19  ;;  %v935_v32 = vld [vmem:[%s2437_s4] sm:$0xff]  ;;  %s2380_s29 = scalar_lea.hbm %s2438_s5, %s1779_s17  ;;  %s1848_s10 = scalar_lea.vmem %s1847_s9, 2048 }
  0x1a   : > { %v372_v22 = vand.u32 4294901760, %v2039_v15  ;;  %v383_v23 = vand.u32 4294901760, %v2042_v16  ;;  %v2061_v26 = vand.u32 4294901760, %v299_v25  ;;  %v394_v30 = vand.u32 4294901760, %v2051_v18  ;;  %p1850_p2 = scmp.lt.s32.totalorder %s1848_s10, %s1842_s7 }
  0x1b   : > { %265 = vperm.xlu1 %1840, %v259_v17   ;;  %275 = vperm.xlu0 %1839, %v261_v20   ;;  %v301_v29 = vsel %vm298_vm1, %v284_v24, 0  ;;  %v405_v39 = vand.u32 4294901760, %v2072_v31 }
  0x1c   : > { %v373_v27 = vsub.f32 %v2039_v15, %v372_v22  ;;  %v333_v33 = vand.u32 4294901760, %v301_v29  ;;  %v384_v35 = vsub.f32 %v2042_v16, %v383_v23  ;;  %v451_v36 = vsub.f32 %v299_v25, %v2061_v26  ;;  %p1851_p3 = por %p1850_p2, %p1849_p1 }
  0x1d   : > { %v395_v44 = vsub.f32 %v2051_v18, %v394_v30  ;;  %v406_v50 = vsub.f32 %v2072_v31, %v405_v39 }
  0x1e   : > { %v374_v34 = vand.u32 4294901760, %v373_v27  ;;  %334 = vmatprep.subr.mxu0 %v333_v33  ;;  %v445_v37 = vsub.f32 %v301_v29, %v333_v33  ;;  %v452_v38 = vand.u32 4294901760, %v451_v36  ;;  %v385_v41 = vand.u32 4294901760, %v384_v35  ;;  %v931_v29 = vld [vmem:[%s2436_s3] sm:$0xff]  ;;  %p1852_p5 = pnand %p1851_p3, %p1845_p0 }
  0x1f   : > { %946 = vperm.xlu1 %1840, %v936_v28   ;;  %941 = vperm.xlu0 %1839, %v935_v32   ;;  %v396_v49 = vand.u32 4294901760, %v395_v44  ;;  %v407_v51 = vand.u32 4294901760, %v406_v50 }
  0x20   : > { %336 = vmatpush1.msra.mxu0 %v2061_v26  ;;  %v446_v42 = vand.u32 4294901760, %v445_v37  ;;  %v453_v43 = vsub.f32 %v451_v36, %v452_v38 }
  0x21   : > { %375 = vmatmul.mubr.f32.vlgmr.msra.gmra.mxu0 %v374_v34  ;;  %549 = vmatprep.subr.mxu0 %v445_v37 }
  0x22   : > { %380 = vmatprep.mubr.f32.mxu0 %v1920_v2  ;;  %552 = vmatpush1.msra.mxu0 %v451_v36  ;;  %v447_v46 = vsub.f32 %v445_v37, %v446_v42  ;;  %v454_v47 = vand.u32 4294901760, %v453_v43 }
  0x23   : > { %754 = vmatprep.subr.mxu0 %v446_v42  ;;  %951 = vperm.xlu0 %1839, %v937_v40   ;;  %v961_v40 = vsel %vm959_vm2, %v931_v29, 0 }
  0x24   : > { %956 = vperm.xlu1 %1840, %v938_v45   ;;  %v448_v48 = vand.u32 4294901760, %v447_v46 }
  0x25   : > { %386 = vmatmul.mubr.f32.gmra.mxu0 %v385_v41 }
  0x26   : > { %391 = vmatprep.mubr.f32.mxu0 %v1920_v2  ;;  %449 = vmatprep.subr.mxu1 %v448_v48 }
  0x27   : > { %455 = vmatpush1.msra.mxu1 %v454_v47 }
  0x28   : > { %490 = vmatmul.mubr.f32.vlgmr.msra.gmra.mxu1 %v2029_v8  ;;  %649 = vmatprep.subr.mxu1 %v333_v33 }
  0x29   : > { %397 = vmatmul.mubr.f32.gmra.mxu0 %v396_v49  ;;  %495 = vmatprep.mubr.f32.mxu1 %v1920_v2 }
  0x2a   : > { %402 = vmatprep.mubr.f32.mxu0 %v1920_v2  ;;  %651 = vmatpush1.msra.mxu1 %v2061_v26 }
  0x2b   : > { %851 = vmatprep.subr.mxu1 %v333_v33 }
  0x2c   : > { %497 = vmatmul.mubr.f32.gmra.mxu1 %v2031_v9 }
  0x2d   : > { %408 = vmatmul.mubr.f32.gmra.mxu0 %v407_v51  ;;  %502 = vmatprep.mubr.f32.mxu1 %v1920_v2 }
  0x2e   : > { %585 = vmatprep.mubr.f32.mxu0 %v1920_v2 }
  0x30   : > { %504 = vmatmul.mubr.f32.gmra.mxu1 %v2033_v13 }
  0x31   : > { %588 = vmatmul.mubr.f32.vlgmr.msra.gmra.mxu0 %v2039_v15  ;;  %509 = vmatprep.mubr.f32.mxu1 %v1920_v2 }
  0x32   : > { %593 = vmatprep.mubr.f32.mxu0 %v1920_v2  ;;  %758 = vmatpush1.msra.mxu0 %v452_v38 }
  0x34   : > { %511 = vmatmul.mubr.f32.gmra.mxu1 %v2053_v19 }
  0x35   : > { %596 = vmatmul.mubr.f32.gmra.mxu0 %v2042_v16  ;;  %684 = vmatprep.mubr.f32.mxu1 %v1920_v2 }
  0x36   : > { %601 = vmatprep.mubr.f32.mxu0 %v1920_v2 }
  0x38   : > { %688 = vmatmul.mubr.f32.vlgmr.msra.gmra.mxu1 %v372_v22 }
  0x39   : > { %604 = vmatmul.mubr.f32.gmra.mxu0 %v2051_v18  ;;  %693 = vmatprep.mubr.f32.mxu1 %v1920_v2 }
  0x3a   : > { %609 = vmatprep.mubr.f32.mxu0 %v1920_v2  ;;  %853 = vmatpush1.msra.mxu1 %v2061_v26 }
  0x3c   : > { %697 = vmatmul.mubr.f32.gmra.mxu1 %v383_v23 }
  0x3d   : > { %612 = vmatmul.mubr.f32.gmra.mxu0 %v2072_v31  ;;  %702 = vmatprep.mubr.f32.mxu1 %v1920_v2 }
  0x3e   : > { %791 = vmatprep.mubr.f32.mxu0 %v1920_v2 }
  0x40   : > { %706 = vmatmul.mubr.f32.gmra.mxu1 %v394_v30 }
  0x41   : > { %793 = vmatmul.mubr.f32.vlgmr.msra.gmra.mxu0 %v2029_v8  ;;  %711 = vmatprep.mubr.f32.mxu1 %v1920_v2 }
  0x42   : > { %798 = vmatprep.mubr.f32.mxu0 %v1920_v2 }
  0x44   : > { %715 = vmatmul.mubr.f32.gmra.mxu1 %v405_v39 }
  0x45   : > { %800 = vmatmul.mubr.f32.gmra.mxu0 %v2031_v9  ;;  %886 = vmatprep.mubr.f32.mxu1 %v1920_v2 }
  0x46   : > { %805 = vmatprep.mubr.f32.mxu0 %v1920_v2 }
  0x48   : > { %888 = vmatmul.mubr.f32.vlgmr.msra.gmra.mxu1 %v2029_v8 }
  0x49   : > { %807 = vmatmul.mubr.f32.gmra.mxu0 %v2033_v13  ;;  %893 = vmatprep.mubr.f32.mxu1 %v1920_v2 }
  0x4a   : > { %812 = vmatprep.mubr.f32.mxu0 %v1920_v2 }
  0x4c   : > { %895 = vmatmul.mubr.f32.gmra.mxu1 %v2031_v9 }
  0x4d   : > { %814 = vmatmul.mubr.f32.gmra.mxu0 %v2053_v19  ;;  %900 = vmatprep.mubr.f32.mxu1 %v1920_v2 }
  0x4e   : > { %1044 = vmatprep.mubr.f32.mxu0 %v1920_v2 }
  0x50   : > { %902 = vmatmul.mubr.f32.gmra.mxu1 %v2033_v13 }
  0x51   : > { %907 = vmatprep.mubr.f32.mxu1 %v1920_v2 }
  0x54   : > { %909 = vmatmul.mubr.f32.gmra.mxu1 %v2053_v19 }
  0x55   : > { %1193 = vmatprep.mubr.f32.mxu1 %v1920_v2 }
  0x92   : > { %v281_v13 = vpop.permute.xlu0 %280  ;;  %v271_v16 = vpop.permute.xlu1 %270 }
  0x96   : > { %v276_v21 = vpop.permute.xlu0 %275  ;;  %v266_v25 = vpop.permute.xlu1 %265 }
  0xe1   : > { %v376_v52 = vpop.f32.mrf.mxu0 }
  0xe2   : > { %v377_v30 = vadd.f32 %v376_v52, %v266_v25  ;;  %v2145_v52 = vand.u32 4294901760, %v961_v40 }
  0xe3   : > { %v378_v53 = vpop.f32.mrf.mxu0 }
  0xe4   : > { %v379_v31 = vadd.f32 %v378_v53, %v266_v25 }
  0xe5   : > { %v387_v54 = vpop.f32.mrf.mxu0 }
  0xe6   : > { %v388_v24 = vadd.f32 %v387_v54, %v271_v16 }
  0xe7   : > { %v389_v55 = vpop.f32.mrf.mxu0 }
  0xe8   : > { %v491_v57 = vpop.f32.mrf.mxu1  ;;  %v390_v32 = vadd.f32 %v389_v55, %v271_v16 }
  0xe9   : > { %v398_v56 = vpop.f32.mrf.mxu0  ;;  %v492_v44 = vadd.f32 %v491_v57, %v377_v30 }
  0xea   : > { %v493_v59 = vpop.f32.mrf.mxu1  ;;  %v399_v28 = vadd.f32 %v398_v56, %v276_v21 }
  0xeb   : > { %v400_v58 = vpop.f32.mrf.mxu0  ;;  %v494_v36 = vadd.f32 %v493_v59, %v379_v31 }
  0xec   : > { %v498_v61 = vpop.f32.mrf.mxu1  ;;  %v401_v45 = vadd.f32 %v400_v58, %v276_v21 }
  0xed   : > { %v409_v60 = vpop.f32.mrf.mxu0  ;;  %v499_v35 = vadd.f32 %v498_v61, %v388_v24 }
  0xee   : > { %v500_v63 = vpop.f32.mrf.mxu1  ;;  %v410_v41 = vadd.f32 %v409_v60, %v281_v13 }
  0xef   : > { %v411_v62 = vpop.f32.mrf.mxu0  ;;  %v501_v37 = vadd.f32 %v500_v63, %v390_v32 }
  0xf0   : > { %v505_v0 = vpop.f32.mrf.mxu1  ;;  %v412_v61 = vadd.f32 %v411_v62, %v281_v13 }
  0xf1   : > { %v589_v1 = vpop.f32.mrf.mxu0  ;;  %v506_v42 = vadd.f32 %v505_v0, %v399_v28 }
  0xf2   : > { %v507_v3 = vpop.f32.mrf.mxu1  ;;  %v590_v53 = vadd.f32 %v589_v1, %v492_v44 }
  0xf3   : > { %v591_v4 = vpop.f32.mrf.mxu0  ;;  %v508_v54 = vadd.f32 %v507_v3, %v401_v45 }
  0xf4   : > { %v512_v5 = vpop.f32.mrf.mxu1  ;;  %v592_v46 = vadd.f32 %v591_v4, %v494_v36 }
  0xf5   : > { %v597_v6 = vpop.f32.mrf.mxu0  ;;  %v513_v63 = vadd.f32 %v512_v5, %v410_v41 }
  0xf6   : > { %v514_v7 = vpop.f32.mrf.mxu1  ;;  %v598_v43 = vadd.f32 %v597_v6, %v499_v35 }
  0xf7   : > { %v599_v8 = vpop.f32.mrf.mxu0  ;;  %v515_v21 = vadd.f32 %v514_v7, %v412_v61  ;;  %v932_v7 = vld [vmem:[%s2436_s3 + $0x8] sm:$0xff]  ;;  %v934_v61 = vld [vmem:[%s2436_s3 + $0x18] sm:$0xff] }
  0xf8   : > { %v689_v10 = vpop.f32.mrf.mxu1  ;;  %v600_v47 = vadd.f32 %v599_v8, %v501_v37  ;;  %v964_v35 = vsel %vm959_vm2, %v932_v7, 0 }
  0xf9   : > { %v605_v9 = vpop.f32.mrf.mxu0  ;;  %v690_v6 = vadd.f32 %v689_v10, %v590_v53 }
  0xfa   : > { %v691_v12 = vpop.f32.mrf.mxu1  ;;  %v606_v50 = vadd.f32 %v605_v9, %v506_v42 }
  0xfb   : > { %v607_v11 = vpop.f32.mrf.mxu0  ;;  %v692_v55 = vadd.f32 %v691_v12, %v592_v46 }
  0xfc   : > { %v698_v15 = vpop.f32.mrf.mxu1  ;;  %v608_v57 = vadd.f32 %v607_v11, %v508_v54 }
  0xfd   : > { %v613_v14 = vpop.f32.mrf.mxu0  ;;  %v699_v51 = vadd.f32 %v698_v15, %v598_v43  ;;  %v933_v43 = vld [vmem:[%s2436_s3 + $0x10] sm:$0xff] }
  0xfe   : > { %v700_v18 = vpop.f32.mrf.mxu1  ;;  %v614_v9 = vadd.f32 %v613_v14, %v513_v63  ;;  %v967_v54 = vsel %vm959_vm2, %v933_v43, 0 }
  0xff   : > { %v615_v17 = vpop.f32.mrf.mxu0  ;;  %v701_v56 = vadd.f32 %v700_v18, %v600_v47 }
 0x100   : > { %v707_v19 = vpop.f32.mrf.mxu1  ;;  %v616_v28 = vadd.f32 %v615_v17, %v515_v21  ;;  %v2151_v17 = vsub.f32 %v961_v40, %v2145_v52  ;;  %v2157_v40 = vand.u32 4294901760, %v964_v35 }
 0x101   : > { %v794_v20 = vpop.f32.mrf.mxu0  ;;  %v708_v60 = vadd.f32 %v707_v19, %v606_v50 }
 0x102   : > { %v709_v22 = vpop.f32.mrf.mxu1  ;;  %v795_v25 = vadd.f32 %v794_v20, %v690_v6 }
 0x103   : > { %v796_v23 = vpop.f32.mrf.mxu0  ;;  %v710_v1 = vadd.f32 %v709_v22, %v608_v57 }
 0x104   : > { %v716_v26 = vpop.f32.mrf.mxu1  ;;  %v797_v58 = vadd.f32 %v796_v23, %v692_v55 }
 0x105   : > { %v801_v27 = vpop.f32.mrf.mxu0  ;;  %v717_v62 = vadd.f32 %v716_v26, %v614_v9  ;;  %v970_v9 = vsel %vm959_vm2, %v934_v61, 0 }
 0x106   : > { %v718_v33 = vpop.f32.mrf.mxu1  ;;  %v802_v0 = vadd.f32 %v801_v27, %v699_v51 }
 0x107   : > { %v803_v34 = vpop.f32.mrf.mxu0  ;;  %v719_v14 = vadd.f32 %v718_v33, %v616_v28 }
 0x108   : > { %v889_v39 = vpop.f32.mrf.mxu1  ;;  %v804_v4 = vadd.f32 %v803_v34, %v701_v56 }
 0x109   : > { %v808_v38 = vpop.f32.mrf.mxu0  ;;  %v890_v13 = vadd.f32 %v889_v39, %v795_v25 }
 0x10a   : > { %v891_v49 = vpop.f32.mrf.mxu1  ;;  %v809_v15 = vadd.f32 %v808_v38, %v708_v60 }
 0x10b   : > { %v810_v48 = vpop.f32.mrf.mxu0  ;;  %v892_v3 = vadd.f32 %v891_v49, %v797_v58  ;;  %v915_v36 = vmul.f32 0.2, %v890_v13  ;;  %v1047_v49 = vand.u32 4294901760, %v2151_v17 }
 0x10c   : > { %v896_v59 = vpop.f32.mrf.mxu1  ;;  %v811_v19 = vadd.f32 %v810_v48, %v710_v1 }
 0x10d   : > { %v815_v8 = vpop.f32.mrf.mxu0  ;;  %v897_v24 = vadd.f32 %v896_v59, %v802_v0  ;;  %v916_v22 = vmul.f32 0.2, %v892_v3  ;;  %v923_v50 = vmax.f32 %v890_v13, %v915_v36  ;;  %v2180_v0 = vsub.f32 %v964_v35, %v2157_v40 }
 0x10e   : > { %v898_v16 = vpop.f32.mrf.mxu1  ;;  %v816_v27 = vadd.f32 %v815_v8, %v717_v62  ;;  %v1048_v21 = vsub.f32 %v2151_v17, %v1047_v49 }
 0x10f   : > { %v899_v12 = vadd.f32 %v898_v16, %v804_v4  ;;  %v817_v10 = vpop.f32.mrf.mxu0  ;;  %v917_v29 = vmul.f32 0.2, %v897_v24  ;;  %v924_v44 = vmax.f32 %v892_v3, %v916_v22  ;;  %v2190_v4 = vand.u32 4294901760, %v967_v54 }
 0x110   : > { %v903_v18 = vpop.f32.mrf.mxu1  ;;  %v818_v26 = vadd.f32 %v817_v10, %v719_v14  ;;  %v2192_v8 = vand.u32 4294901760, %v923_v50 }
 0x111   : > { %v904_v5 = vadd.f32 %v903_v18, %v809_v15  ;;  %v918_v11 = vmul.f32 0.2, %v899_v12  ;;  %v925_v41 = vmax.f32 %v897_v24, %v917_v29  ;;  %v2174_v63 = vand.u32 4294901760, %v924_v44 }
 0x112   : > { %v905_v23 = vpop.f32.mrf.mxu1  ;;  %v2219_v62 = vsub.f32 %v967_v54, %v2190_v4  ;;  %v2224_v13 = vsub.f32 %v923_v50, %v2192_v8 }
 0x113   : > { %v919_v20 = vmul.f32 0.2, %v904_v5  ;;  %v906_v30 = vadd.f32 %v905_v23, %v811_v19  ;;  %v926_v37 = vmax.f32 %v899_v12, %v918_v11  ;;  %v2167_v55 = vand.u32 4294901760, %v925_v41 }
 0x114   : > { %v910_v31 = vpop.f32.mrf.mxu1  ;;  %v2211_v3 = vsub.f32 %v924_v44, %v2174_v63  ;;  %v1058_v12 = vand.u32 4294901760, %v2180_v0  ;;  %v1049_v23 = vand.u32 4294901760, %v1048_v21 }
 0x115   : > { %v927_v32 = vmax.f32 %v904_v5, %v919_v20  ;;  %v911_v34 = vadd.f32 %v910_v31, %v816_v27  ;;  %v920_v38 = vmul.f32 0.2, %v906_v30  ;;  %v2162_v51 = vand.u32 4294901760, %v926_v37 }
 0x116   : > { %v912_v39 = vpop.f32.mrf.mxu1  ;;  %v2202_v15 = vsub.f32 %v925_v41, %v2167_v55  ;;  %v2221_v5 = vand.u32 4294901760, %v970_v9  ;;  %v1059_v27 = vsub.f32 %v2180_v0, %v1058_v12  ;;  %v1151_v29 = vand.u32 4294901760, %v2211_v3 }
 0x117   : > { %v921_v33 = vmul.f32 0.2, %v911_v34  ;;  %v913_v42 = vadd.f32 %v912_v39, %v818_v26  ;;  %v928_v45 = vmax.f32 %v906_v30, %v920_v38  ;;  %v2159_v46 = vand.u32 4294901760, %v927_v32 }
 0x118   : > { %v2195_v16 = vsub.f32 %v926_v37, %v2162_v51  ;;  %v1145_v11 = vand.u32 4294901760, %v2202_v15  ;;  %v1069_v30 = vand.u32 4294901760, %v2219_v62  ;;  %v2248_v31 = vsub.f32 %v970_v9, %v2221_v5 }
 0x119   : > { %v929_v47 = vmax.f32 %v911_v34, %v921_v33  ;;  %v922_v48 = vmul.f32 0.2, %v913_v42  ;;  %v2164_v53 = vand.u32 4294901760, %v928_v45  ;;  %v2183_v6 = vsub.f32 %v927_v32, %v2159_v46 }
 0x11a   : > { %v1139_v10 = vand.u32 4294901760, %v2195_v16  ;;  %v1157_v26 = vand.u32 4294901760, %v2224_v13  ;;  %v1146_v36 = vsub.f32 %v2202_v15, %v1145_v11  ;;  %v1060_v37 = vand.u32 4294901760, %v1059_v27 }
 0x11b   : > { %v2169_v56 = vand.u32 4294901760, %v929_v47  ;;  %v930_v59 = vmax.f32 %v913_v42, %v922_v48  ;;  %v2177_v60 = vsub.f32 %v928_v45, %v2164_v53  ;;  %v1133_v18 = vand.u32 4294901760, %v2183_v6 }
 0x11c   : > { %v1140_v34 = vsub.f32 %v2195_v16, %v1139_v10  ;;  %v1152_v38 = vsub.f32 %v2211_v3, %v1151_v29  ;;  %v1070_v41 = vsub.f32 %v2219_v62, %v1069_v30  ;;  %v1080_v33 = vand.u32 4294901760, %v2248_v31 }
 0x11d   : > { %v2186_v57 = vsub.f32 %v929_v47, %v2169_v56  ;;  %v2188_v58 = vand.u32 4294901760, %v930_v59  ;;  %v1127_v1 = vand.u32 4294901760, %v2177_v60  ;;  %v1134_v22 = vsub.f32 %v2183_v6, %v1133_v18 }
 0x11e   : > { %v1141_v42 = vand.u32 4294901760, %v1140_v34  ;;  %v1158_v43 = vsub.f32 %v2224_v13, %v1157_v26  ;;  %v1147_v44 = vand.u32 4294901760, %v1146_v36  ;;  %v1153_v45 = vand.u32 4294901760, %v1152_v38 }
 0x11f   : > { %v1121_v24 = vand.u32 4294901760, %v2186_v57  ;;  %v2206_v25 = vsub.f32 %v930_v59, %v2188_v58  ;;  %997 = vmatprep.subr.mxu0 %v2188_v58  ;;  %v1128_v14 = vsub.f32 %v2177_v60, %v1127_v1  ;;  %v1135_v39 = vand.u32 4294901760, %v1134_v22 }
 0x120   : > { %999 = vmatpush1.msra.mxu0 %v2169_v56  ;;  %v1071_v47 = vand.u32 4294901760, %v1070_v41  ;;  %v1081_v48 = vsub.f32 %v2248_v31, %v1080_v33  ;;  %v1159_v50 = vand.u32 4294901760, %v1158_v43 }
 0x121   : > { %1001 = vmatprep.subr.mxu0 %v2164_v53  ;;  %v1115_v28 = vand.u32 4294901760, %v2206_v25  ;;  %v1122_v19 = vsub.f32 %v2186_v57, %v1121_v24  ;;  %v1129_v35 = vand.u32 4294901760, %v1128_v14 }
 0x122   : > { %1003 = vmatpush1.msra.mxu0 %v2159_v46  ;;  %v1082_v54 = vand.u32 4294901760, %v1081_v48 }
 0x123   : > { %1005 = vmatprep.subr.mxu0 %v2162_v51  ;;  %v1116_v7 = vsub.f32 %v2206_v25, %v1115_v28  ;;  %v1123_v32 = vand.u32 4294901760, %v1122_v19 }
 0x124   : > { %1007 = vmatpush1.msra.mxu0 %v2167_v55 }
 0x125   : > { %1009 = vmatprep.subr.mxu0 %v2174_v63  ;;  %v1117_v20 = vand.u32 4294901760, %v1116_v7 }
 0x126   : > { %1011 = vmatpush1.msra.mxu0 %v2192_v8 }
 0x127   : > { %1050 = vmatmul.mubr.f32.vlgmr.msra.gmra.mxu0 %v1049_v23  ;;  %1118 = vmatprep.subr.mxu1 %v1117_v20 }
 0x128   : > { %1248 = vmatprep.subr.mxu0 %v2206_v25  ;;  %1124 = vmatpush1.msra.mxu1 %v1123_v32 }
 0x129   : > { %1251 = vmatpush1.msra.mxu0 %v2186_v57  ;;  %1130 = vmatprep.subr.mxu1 %v1129_v35 }
 0x12a   : > { %1254 = vmatprep.subr.mxu0 %v2177_v60  ;;  %1055 = vmatprep.mubr.f32.mxu0 %v1920_v2 }
 0x12b   : > { %1136 = vmatpush1.msra.mxu1 %v1135_v39  ;;  %1257 = vmatpush1.msra.mxu0 %v2183_v6 }
 0x12c   : > { %1061 = vmatmul.mubr.f32.gmra.mxu0 %v1060_v37  ;;  %1142 = vmatprep.subr.mxu1 %v1141_v42 }
 0x12d   : > { %1260 = vmatprep.subr.mxu0 %v2195_v16  ;;  %1148 = vmatpush1.msra.mxu1 %v1147_v44 }
 0x12e   : > { %1263 = vmatpush1.msra.mxu0 %v2202_v15  ;;  %1154 = vmatprep.subr.mxu1 %v1153_v45 }
 0x12f   : > { %1266 = vmatprep.subr.mxu0 %v2211_v3  ;;  %1066 = vmatprep.mubr.f32.mxu0 %v1920_v2  ;;  %v942_v3 = vpop.permute.xlu0 %941 }
 0x130   : > { %1160 = vmatpush1.msra.mxu1 %v1159_v50  ;;  %1269 = vmatpush1.msra.mxu0 %v2224_v13 }
 0x131   : > { %1072 = vmatmul.mubr.f32.gmra.mxu0 %v1071_v47  ;;  %1195 = vmatmul.mubr.f32.vlgmr.msra.gmra.mxu1 %v2145_v52 }
 0x132   : > { %1360 = vmatprep.subr.mxu1 %v2188_v58  ;;  %1471 = vmatprep.subr.mxu0 %v1115_v28 }
 0x133   : > { %1362 = vmatpush1.msra.mxu1 %v2169_v56  ;;  %1077 = vmatprep.mubr.f32.mxu0 %v1920_v2  ;;  %v952_v20 = vpop.permute.xlu0 %951 }
 0x134   : > { %1364 = vmatprep.subr.mxu1 %v2164_v53  ;;  %1200 = vmatprep.mubr.f32.mxu1 %v1920_v2 }
 0x135   : > { %1366 = vmatpush1.msra.mxu1 %v2159_v46  ;;  %1083 = vmatmul.mubr.f32.gmra.mxu0 %v1082_v54 }
 0x136   : > { %1202 = vmatmul.mubr.f32.gmra.mxu1 %v2157_v40  ;;  %1368 = vmatprep.subr.mxu1 %v2162_v51 }
 0x137   : > { %1370 = vmatpush1.msra.mxu1 %v2167_v55  ;;  %1207 = vmatprep.mubr.f32.mxu1 %v1920_v2 }
 0x138   : > { %1372 = vmatprep.subr.mxu1 %v2174_v63  ;;  %1302 = vmatprep.mubr.f32.mxu0 %v1920_v2 }
 0x139   : > { %1374 = vmatpush1.msra.mxu1 %v2192_v8  ;;  %1305 = vmatmul.mubr.f32.vlgmr.msra.gmra.mxu0 %v2151_v17 }
 0x13a   : > { %1209 = vmatmul.mubr.f32.gmra.mxu1 %v2190_v4  ;;  %1475 = vmatpush1.msra.mxu0 %v1121_v24 }
 0x13b   : > { %1586 = vmatprep.subr.mxu1 %v2188_v58  ;;  %1479 = vmatprep.subr.mxu0 %v1127_v1 }
 0x13c   : > { %1483 = vmatpush1.msra.mxu0 %v1133_v18  ;;  %1214 = vmatprep.mubr.f32.mxu1 %v1920_v2 }
 0x13d   : > { %1310 = vmatprep.mubr.f32.mxu0 %v1920_v2  ;;  %1487 = vmatprep.subr.mxu0 %v1139_v10  ;;  %v947_v10 = vpop.permute.xlu1 %946 }
 0x13e   : > { %1216 = vmatmul.mubr.f32.gmra.mxu1 %v2221_v5  ;;  %1313 = vmatmul.mubr.f32.gmra.mxu0 %v2180_v0 }
 0x13f   : > { %1491 = vmatpush1.msra.mxu0 %v1145_v11  ;;  %1318 = vmatprep.mubr.f32.mxu0 %v1920_v2 }
 0x140   : > { %1495 = vmatprep.subr.mxu0 %v1151_v29  ;;  %1407 = vmatprep.mubr.f32.mxu1 %v1920_v2 }
 0x141   : > { %1499 = vmatpush1.msra.mxu0 %v1157_v26  ;;  %v957_v44 = vpop.permute.xlu1 %956 }
 0x142   : > { %1321 = vmatmul.mubr.f32.gmra.mxu0 %v2219_v62  ;;  %1411 = vmatmul.mubr.f32.vlgmr.msra.gmra.mxu1 %v1047_v49 }
 0x143   : > { %1588 = vmatpush1.msra.mxu1 %v2169_v56  ;;  %1326 = vmatprep.mubr.f32.mxu0 %v1920_v2 }
 0x144   : > { %1590 = vmatprep.subr.mxu1 %v2164_v53  ;;  %1416 = vmatprep.mubr.f32.mxu1 %v1920_v2 }
 0x145   : > { %1592 = vmatpush1.msra.mxu1 %v2159_v46 }
 0x146   : > { %1594 = vmatprep.subr.mxu1 %v2162_v51  ;;  %1329 = vmatmul.mubr.f32.gmra.mxu0 %v2248_v31 }
 0x147   : > { %1420 = vmatmul.mubr.f32.gmra.mxu1 %v1058_v12  ;;  %1532 = vmatprep.mubr.f32.mxu0 %v1920_v2 }
 0x148   : > { %1596 = vmatpush1.msra.mxu1 %v2167_v55  ;;  %1425 = vmatprep.mubr.f32.mxu1 %v1920_v2 }
 0x149   : > { %1598 = vmatprep.subr.mxu1 %v2174_v63 }
 0x14a   : > { %1600 = vmatpush1.msra.mxu1 %v2192_v8  ;;  %1534 = vmatmul.mubr.f32.vlgmr.msra.gmra.mxu0 %v2145_v52 }
 0x14b   : > { %1429 = vmatmul.mubr.f32.gmra.mxu1 %v1069_v30  ;;  %1539 = vmatprep.mubr.f32.mxu0 %v1920_v2 }
 0x14c   : > { %1434 = vmatprep.mubr.f32.mxu1 %v1920_v2 }
 0x14e   : > { %1541 = vmatmul.mubr.f32.gmra.mxu0 %v2157_v40 }
 0x14f   : > { %1438 = vmatmul.mubr.f32.gmra.mxu1 %v1080_v33  ;;  %1546 = vmatprep.mubr.f32.mxu0 %v1920_v2 }
 0x150   : > { %1633 = vmatprep.mubr.f32.mxu1 %v1920_v2 }
 0x152   : > { %1548 = vmatmul.mubr.f32.gmra.mxu0 %v2190_v4 }
 0x153   : > { %1635 = vmatmul.mubr.f32.vlgmr.msra.gmra.mxu1 %v2145_v52  ;;  %1553 = vmatprep.mubr.f32.mxu0 %v1920_v2 }
 0x154   : > { %1640 = vmatprep.mubr.f32.mxu1 %v1920_v2 }
 0x156   : > { %1555 = vmatmul.mubr.f32.gmra.mxu0 %v2221_v5 }
 0x157   : > { %1642 = vmatmul.mubr.f32.gmra.mxu1 %v2157_v40 }
 0x158   : > { %1647 = vmatprep.mubr.f32.mxu1 %v1920_v2 }
 0x15b   : > { %1649 = vmatmul.mubr.f32.gmra.mxu1 %v2190_v4 }
 0x15c   : > { %1654 = vmatprep.mubr.f32.mxu1 %v1920_v2 }
 0x15f   : > { %1656 = vmatmul.mubr.f32.gmra.mxu1 %v2221_v5 }
 0x1e7   : > { %v1051_v17 = vpop.f32.mrf.mxu0 }
 0x1e8   : > { %v1052_v18 = vadd.f32 %v1051_v17, %v942_v3 }
 0x1e9   : > { %v1053_v46 = vpop.f32.mrf.mxu0 }
 0x1ea   : > { %v1054_v5 = vadd.f32 %v1053_v46, %v942_v3 }
 0x1ec   : > { %v1062_v49 = vpop.f32.mrf.mxu0 }
 0x1ed   : > { %v1063_v23 = vadd.f32 %v1062_v49, %v947_v10 }
 0x1ee   : > { %v1064_v52 = vpop.f32.mrf.mxu0 }
 0x1ef   : > { %v1065_v22 = vadd.f32 %v1064_v52, %v947_v10 }
 0x1f1   : > { %v1073_v51 = vpop.f32.mrf.mxu0  ;;  %v1196_v53 = vpop.f32.mrf.mxu1 }
 0x1f2   : > { %v1197_v13 = vadd.f32 %v1196_v53, %v1052_v18  ;;  %v1074_v34 = vadd.f32 %v1073_v51, %v952_v20 }
 0x1f3   : > { %v1075_v55 = vpop.f32.mrf.mxu0  ;;  %v1198_v56 = vpop.f32.mrf.mxu1 }
 0x1f4   : > { %v1199_v7 = vadd.f32 %v1198_v56, %v1054_v5  ;;  %v1076_v33 = vadd.f32 %v1075_v55, %v952_v20 }
 0x1f5   : > { %v1084_v59 = vpop.f32.mrf.mxu0 }
 0x1f6   : > { %v1203_v61 = vpop.f32.mrf.mxu1  ;;  %v1085_v54 = vadd.f32 %v1084_v59, %v957_v44 }
 0x1f7   : > { %v2355_v63 = vpop.f32.mrf.mxu0  ;;  %v1204_v30 = vadd.f32 %v1203_v61, %v1063_v23 }
 0x1f8   : > { %v1205_v40 = vpop.f32.mrf.mxu1  ;;  %v1087_v56 = vadd.f32 %v2355_v63, %v957_v44 }
 0x1f9   : > { %v1306_v60 = vpop.f32.mrf.mxu0  ;;  %v1206_v36 = vadd.f32 %v1205_v40, %v1065_v22 }
 0x1fa   : > { %v1210_v0 = vpop.f32.mrf.mxu1  ;;  %v1307_v14 = vadd.f32 %v1306_v60, %v1197_v13 }
 0x1fb   : > { %v1308_v6 = vpop.f32.mrf.mxu0  ;;  %v1211_v42 = vadd.f32 %v1210_v0, %v1074_v34 }
 0x1fc   : > { %v1212_v57 = vpop.f32.mrf.mxu1  ;;  %v1309_v31 = vadd.f32 %v1308_v6, %v1199_v7 }
 0x1fd   : > { %v1213_v17 = vadd.f32 %v1212_v57, %v1076_v33 }
 0x1fe   : > { %v1217_v2 = vpop.f32.mrf.mxu1  ;;  %v1314_v58 = vpop.f32.mrf.mxu0 }
 0x1ff   : > { %v1315_v37 = vadd.f32 %v1314_v58, %v1204_v30  ;;  %v1218_v61 = vadd.f32 %v1217_v2, %v1085_v54 }
 0x200   : > { %v2357_v4 = vpop.f32.mrf.mxu1  ;;  %v1316_v8 = vpop.f32.mrf.mxu0 }
 0x201   : > { %v1317_v45 = vadd.f32 %v1316_v8, %v1206_v36  ;;  %v1220_v57 = vadd.f32 %v2357_v4, %v1087_v56 }
 0x202   : > { %v1322_v16 = vpop.f32.mrf.mxu0  ;;  %v1412_v21 = vpop.f32.mrf.mxu1 }
 0x203   : > { %v1413_v26 = vadd.f32 %v1412_v21, %v1307_v14  ;;  %v1323_v52 = vadd.f32 %v1322_v16, %v1211_v42 }
 0x204   : > { %v1324_v9 = vpop.f32.mrf.mxu0  ;;  %v1414_v15 = vpop.f32.mrf.mxu1 }
 0x205   : > { %v1415_v38 = vadd.f32 %v1414_v15, %v1309_v31  ;;  %v1325_v60 = vadd.f32 %v1324_v9, %v1213_v17 }
 0x206   : > { %v1330_v24 = vpop.f32.mrf.mxu0 }
 0x207   : > { %v1421_v25 = vpop.f32.mrf.mxu1  ;;  %v1331_v16 = vadd.f32 %v1330_v24, %v1218_v61 }
 0x208   : > { %v2359_v1 = vpop.f32.mrf.mxu0  ;;  %v1422_v47 = vadd.f32 %v1421_v25, %v1315_v37 }
 0x209   : > { %v1423_v12 = vpop.f32.mrf.mxu1  ;;  %v1333_v9 = vadd.f32 %v2359_v1, %v1220_v57 }
 0x20a   : > { %v1535_v28 = vpop.f32.mrf.mxu0  ;;  %v1424_v51 = vadd.f32 %v1423_v12, %v1317_v45 }
 0x20b   : > { %v1430_v62 = vpop.f32.mrf.mxu1  ;;  %v1536_v39 = vadd.f32 %v1535_v28, %v1413_v26 }
 0x20c   : > { %v1537_v19 = vpop.f32.mrf.mxu0  ;;  %v1431_v0 = vadd.f32 %v1430_v62, %v1323_v52 }
 0x20d   : > { %v1432_v11 = vpop.f32.mrf.mxu1  ;;  %v1538_v48 = vadd.f32 %v1537_v19, %v1415_v38 }
 0x20e   : > { %v1542_v27 = vpop.f32.mrf.mxu0  ;;  %v1433_v21 = vadd.f32 %v1432_v11, %v1325_v60 }
 0x20f   : > { %v1439_v29 = vpop.f32.mrf.mxu1  ;;  %v1543_v53 = vadd.f32 %v1542_v27, %v1422_v47 }
 0x210   : > { %v1544_v32 = vpop.f32.mrf.mxu0  ;;  %v1440_v25 = vadd.f32 %v1439_v29, %v1331_v16 }
 0x211   : > { %v1441_v35 = vpop.f32.mrf.mxu1  ;;  %v1545_v59 = vadd.f32 %v1544_v32, %v1424_v51 }
 0x212   : > { %v1549_v41 = vpop.f32.mrf.mxu0  ;;  %v1442_v28 = vadd.f32 %v1441_v35, %v1333_v9 }
 0x213   : > { %v1636_v43 = vpop.f32.mrf.mxu1  ;;  %v1550_v15 = vadd.f32 %v1549_v41, %v1431_v0 }
 0x214   : > { %v1637_v50 = vadd.f32 %v1636_v43, %v1536_v39  ;;  %v1551_v46 = vpop.f32.mrf.mxu0 }
 0x215   : > { %v1638_v49 = vpop.f32.mrf.mxu1  ;;  %v1552_v3 = vadd.f32 %v1551_v46, %v1433_v21 }
 0x216   : > { %1662 = vst [vmem:[%s2364_s16] sm:$0xff] %v1637_v50  ;;  %v1639_v55 = vadd.f32 %v1638_v49, %v1538_v48  ;;  %v1556_v58 = vpop.f32.mrf.mxu0 }
 0x217   : > { %v1643_v40 = vpop.f32.mrf.mxu1  ;;  %v1557_v24 = vadd.f32 %v1556_v58, %v1440_v25 }
 0x218   : > { %1663 = vst [vmem:[%s2364_s16 + $0x8] sm:$0xff] %v1639_v55  ;;  %v1644_v6 = vadd.f32 %v1643_v40, %v1543_v53  ;;  %v1558_v4 = vpop.f32.mrf.mxu0 }
 0x219   : > { %v1645_v8 = vpop.f32.mrf.mxu1  ;;  %v1559_v13 = vadd.f32 %v1558_v4, %v1442_v28 }
 0x21a   : > { %1664 = vst [vmem:[%s2364_s16 + $0x10] sm:$0xff] %v1644_v6  ;;  %v1646_v63 = vadd.f32 %v1645_v8, %v1545_v59 }
 0x21b   : > { %v1650_v2 = vpop.f32.mrf.mxu1 }
 0x21c   : > { %1665 = vst [vmem:[%s2364_s16 + $0x18] sm:$0xff] %v1646_v63  ;;  %v1651_v12 = vadd.f32 %v1650_v2, %v1550_v15 }
 0x21d   : > { %v1652_v18 = vpop.f32.mrf.mxu1 }
 0x21e   : > { %1666 = vst [vmem:[%s2364_s16 + $0x20] sm:$0xff] %v1651_v12  ;;  %v1653_v62 = vadd.f32 %v1652_v18, %v1552_v3 }
 0x21f   : > { %v1657_v5 = vpop.f32.mrf.mxu1 }
 0x220   : > { %1667 = vst [vmem:[%s2364_s16 + $0x28] sm:$0xff] %v1653_v62  ;;  %v1658_v1 = vadd.f32 %v1657_v5, %v1557_v24 }
 0x221   : > { %v1659_v19 = vpop.f32.mrf.mxu1 }
 0x222   : > { %1668 = vst [vmem:[%s2364_s16 + $0x30] sm:$0xff] %v1658_v1  ;;  %v1660_v10 = vadd.f32 %v1659_v19, %v1559_v13 }
 0x224   : > { %1669 = vst [vmem:[%s2364_s16 + $0x38] sm:$0xff] %v1660_v10 }
 0x225   : > { %1855 = shalt.err (!%p1852_p5)
}
 0x226   : > { %s1856_s11 = scalar_lea.hbm %s2380_s29, 1024  ;;  %s1860_s14 = scalar_lea.hbm %s2438_s5, 2048 }
 0x227   : > { %p1857_p6 = scmp.ne.s32.totalorder %s2380_s29, %s1856_s11  ;;  %p1861_p10 = scmp.lt.s32.totalorder %s2380_s29, %s2438_s5 }
 0x228   : > { %p1862_p11 = scmp.lt.s32.totalorder %s1860_s14, %s1856_s11 }
 0x229   : > { %p1858_p7 = pnand %p1857_p6, %p1995_p4 }
 0x22a   : > { %p1863_p12 = por %p1862_p11, %p1861_p10 }
 0x22b   : > { %p1859_p9 = pneg %p1858_p7 }
 0x22d   : > { %p1864_p13 = pnand %p1863_p12, %p1859_p9 }
 0x22f   : > { %1867 = shalt.err (!%p1864_p13)
}
 0x230   : > { %s1923_s17 = smov 256   ;;  %s1924_s25 = smov 16  }
 0x231   : > { %1780 = dma.vmem_to_hbm [thread:$0]  (%p1995_p4), %s2382_s24, 1024, %s2380_s29, %s2388_s21, %s1923_s17, %s1923_s17, %s1924_s25  }
 0x232 PF: > { %p1786_p0 = scmp.ge.s32.totalorder %s1918_s23, 2  ;;  %s1701_s27 = sand.u32 1, %s1898_s18  }
 0x233   : > { %s1702_s7 = scalar_lea.sflag [#allocation3], %s1701_s27 }
 0x234   : > { %p1783_p1 = pnand %p1786_p0, %p2002_p8 }
 0x236   : > { %p1784_p2 = pneg %p1783_p1 }
 0x238   : > { %1893 = dma.done.wait (%p1784_p2), %s1702_s7, 1024  }
 0x239   : > { %1895 = vsyncadd (%p1784_p2), %s1702_s7, 4294966272  ;;  %s18_s23 = sadd.s32 1, %s1918_s23   ;;  %s2441_s18 = smov %s1902_s19 }
 0x23a   : > { %p15_p3 = scmp.ge.s32.totalorder %s18_s23, 4   ;;  %s2442_s19 = smov %s1906_s20 }
 0x23b   : > { %s2443_s20 = smov %s2008_s6  ;;  %s2444_s21 = smov %s1914_s22 }
 0x23c   : > { %s2445_s22 = smov %s2447_s26  ;;  %17 = sbr.rel (!%p15_p3) target bundleno = 4 (0x4), region = 75 }
 0x241   :  { %1707 = vsyncpa [#allocation3], 1 }
 0x242   :  { %1709 = vsyncpa [#allocation3 + $0x1], 1 }

</bundles_post_ra>
